<compile_context>
chip_gen: v5e
topology: v5e:2x2
jax: 0.10.0
libtpu: 0.0.40
codegen_flags: <defaults>
</compile_context>

<pallas_src>
import functools

import jax
import jax.numpy as jnp
from jax.experimental import pallas as pl
from jax.experimental.pallas import tpu as pltpu

EPS = 1e-09


def _round_down(x, m):
    return (x // m) * m


def _round_up(x, m):
    return -(-x // m) * m


def _bce_kernel(x_ref, t_ref, out_ref, *, samples_per_block, n_samples, eps):
    # x_ref:   (TB, tn*L) inputs (tn whole sample groups), native dtype
    # t_ref:   (TB, L)    targets for the same batch rows
    # out_ref: (TB, 1)    per-batch-element loss accumulator (f32)
    k = pl.program_id(1)

    @pl.when(k == 0)
    def _():
        out_ref[...] = jnp.zeros_like(out_ref)

    x = x_ref[...].astype(jnp.float32)
    t = t_ref[...].astype(jnp.float32)

    lx = jnp.log(x + eps)          # EUP
    l1x = jnp.log(1.0 - x + eps)   # EUP

    if samples_per_block > 1:
        t_rep = jnp.tile(t, (1, samples_per_block))   # (TB, tn*L)
    else:
        t_rep = t

    # single fused lane reduce: sum over latent dim and over the tn samples
    out_ref[...] += jnp.sum(l1x + t_rep * (lx - l1x), axis=1, keepdims=True)

    @pl.when(k == pl.num_programs(1) - 1)
    def _():
        out_ref[...] = out_ref[...] * (-1.0 / n_samples)


def _vmem_capacity_bytes():
    try:
        return int(pltpu.get_tpu_info().vmem_capacity_bytes)
    except Exception:
        return 64 * 1024 * 1024   # conservative fallback (v7x-sized)


def _choose_tiles(batch, n_samples, latent_dim, itemsize, budget_bytes):
    """Pick (tb, tn): batch tile (multiple of 8) and samples-per-lane-block."""
    full_row = n_samples * latent_dim * itemsize

    # lane tiling only if even an 8-row block of the full row busts the budget
    if 8 * full_row <= budget_bytes:
        tn = n_samples
    else:
        tn = n_samples
        best = None
        for cand in range(1, n_samples):
            if (n_samples % cand == 0
                    and (cand * latent_dim) % 128 == 0
                    and 8 * cand * latent_dim * itemsize <= budget_bytes):
                best = cand
        if best is not None:
            tn = best
        # else: fall back to the full row; vmem_limit_bytes is raised anyway

    block_row = tn * latent_dim * itemsize
    tb = max(8, _round_down(budget_bytes // max(block_row, 1), 8))
    # leave >=2 batch blocks for megacore sharding when the batch allows it
    if batch >= 16:
        tb = min(tb, max(8, _round_down(batch // 2, 8)))
    tb = min(tb, _round_up(batch, 8))
    return tb, tn


def binary_cross_entropy(inp, target, eps=EPS, batch_mean=True):
    """Pallas equivalent of BinaryCrossEntropy.forward.

    inp:    (B, N, L) float (f32 or bf16; kept in native dtype through the DMA)
    target: (B, L) float
    returns scalar if batch_mean else (B,)
    """
    inp = jnp.asarray(inp)
    target = jnp.asarray(target)
    B, N, L = inp.shape

    vmem_cap = _vmem_capacity_bytes()
    # native-dtype input-block budget; intermediates expand it ~4-6x in f32
    budget = min(4 * 1024 * 1024, max(1 * 1024 * 1024, vmem_cap // 32))
    vmem_limit = min(int(vmem_cap * 0.75), 100 * 1024 * 1024)

    itemsize = jnp.dtype(inp.dtype).itemsize
    tb, tn = _choose_tiles(B, N, L, itemsize, budget)

    x2 = inp.reshape(B, N * L)                       # lane-dense slab, contiguous
    padded_B = _round_up(B, tb)
    if padded_B != B:
        pad = padded_B - B
        x2 = jnp.concatenate(
            [x2, jnp.full((pad, N * L), 0.5, dtype=x2.dtype)], axis=0)
        target = jnp.concatenate(
            [target, jnp.zeros((pad, L), dtype=target.dtype)], axis=0)

    grid = (padded_B // tb, N // tn)

    kernel = functools.partial(
        _bce_kernel, samples_per_block=tn, n_samples=N, eps=float(eps))

    per_batch = pl.pallas_call(
        kernel,
        out_shape=jax.ShapeDtypeStruct((padded_B, 1), jnp.float32),
        grid=grid,
        in_specs=[
            pl.BlockSpec((tb, tn * L), lambda i, k: (i, k)),   # input rows / step
            pl.BlockSpec((tb, L), lambda i, k: (i, 0)),        # matching targets
        ],
        out_specs=pl.BlockSpec((tb, 1), lambda i, k: (i, 0)),  # resident accum
        compiler_params=pltpu.CompilerParams(
            dimension_semantics=("parallel", "arbitrary"),
            vmem_limit_bytes=vmem_limit,
        ),
    )(x2, target)

    per_batch = per_batch[:B, 0]                     # drop padded rows -> (B,)
    if batch_mean:
        return jnp.mean(per_batch)
    return per_batch


def _reference(inp, target, eps=EPS, batch_mean=True):
    t = target[:, None, :].astype(jnp.float32)
    x = inp.astype(jnp.float32)
    loss = -t * jnp.log(x + eps) - (1.0 - t) * jnp.log(1.0 - x + eps)
    loss = loss.sum(axis=2).mean(axis=1)
    if batch_mean:
        loss = loss.mean(axis=0)
    return loss


if __name__ == "__main__":
    key = jax.random.PRNGKey(0)

    # case 1: the module's nominal small shape
    B, N, L = 2, 8, 32
    k1, k2, k3, k4 = jax.random.split(key, 4)
    inp = jax.nn.sigmoid(jax.random.normal(k1, (B, N, L), dtype=jnp.float32))
    target = (jax.random.uniform(k2, (B, L)) > 0.5).astype(jnp.float32)

    out = jax.block_until_ready(binary_cross_entropy(inp, target))
    ref = _reference(inp, target)
    assert jnp.allclose(out, ref, rtol=1e-5, atol=1e-5), (out, ref)

    out_pb = jax.block_until_ready(binary_cross_entropy(inp, target, batch_mean=False))
    ref_pb = _reference(inp, target, batch_mean=False)
    assert jnp.allclose(out_pb, ref_pb, rtol=1e-5, atol=1e-5), (out_pb, ref_pb)

    # case 2: awkward batch size exercising the padded / multiple-of-8 tiling
    B2, N2, L2 = 13, 4, 48
    inp2 = jax.nn.sigmoid(jax.random.normal(k3, (B2, N2, L2), dtype=jnp.float32))
    target2 = (jax.random.uniform(k4, (B2, L2)) > 0.5).astype(jnp.float32)
    out2 = jax.block_until_ready(binary_cross_entropy(inp2, target2, batch_mean=False))
    ref2 = _reference(inp2, target2, batch_mean=False)
    assert jnp.allclose(out2, ref2, rtol=1e-5, atol=1e-5), (out2, ref2)

    print("KERNEL_OK")
</pallas_src>

<mosaic_0001>
module attributes {stable_mosaic.version = 11 : i64} {
  func.func @_bce_kernel(%arg0: i32, %arg1: i32, %arg2: memref<8x256xf32, #tpu.memory_space<vmem>>, %arg3: memref<8x32xf32, #tpu.memory_space<vmem>>, %arg4: memref<8x1xf32, #tpu.memory_space<vmem>>) attributes {dimension_semantics = [#tpu.dimension_semantics<parallel>, #tpu.dimension_semantics<arbitrary>], iteration_bounds = array<i64: 1, 1>, scalar_prefetch = 0 : i64, scratch_operands = 0 : i64, tpu.core_type = #tpu.core_type<tc>, window_params = [{transform_indices = @transform_0, window_bounds = array<i64: 8, 256>}, {transform_indices = @transform_1, window_bounds = array<i64: 8, 32>}, {transform_indices = @transform_2, window_bounds = array<i64: 8, 1>}]} {
    %c0_i32 = arith.constant 0 : i32
    %0 = arith.cmpi eq, %arg1, %c0_i32 : i32
    %1 = arith.extui %0 : i1 to i32
    %c0_i32_0 = arith.constant 0 : i32
    %2 = arith.cmpi ne, %1, %c0_i32_0 : i32
    scf.if %2 {
      %cst_13 = arith.constant 0.000000e+00 : f32
      %25 = vector.broadcast %cst_13 : f32 to vector<8x1xf32>
      %c0_14 = arith.constant 0 : index
      %c0_15 = arith.constant 0 : index
      %26 = vector.load %arg4[%c0_14, %c0_15] : memref<8x1xf32, #tpu.memory_space<vmem>>, vector<8x1xf32>
      tpu.vector_store %arg4[%c0_14, %c0_15], %25 {strides = array<i32>} : memref<8x1xf32, #tpu.memory_space<vmem>>, vector<8x1xf32>,
    } else {
    }
    %c0 = arith.constant 0 : index
    %c0_1 = arith.constant 0 : index
    %3 = vector.load %arg2[%c0, %c0_1] : memref<8x256xf32, #tpu.memory_space<vmem>>, vector<8x256xf32>
    %c0_2 = arith.constant 0 : index
    %c0_3 = arith.constant 0 : index
    %4 = vector.load %arg3[%c0_2, %c0_3] : memref<8x32xf32, #tpu.memory_space<vmem>>, vector<8x32xf32>
    %cst = arith.constant 9.99999971E-10 : f32
    %5 = vector.broadcast %cst : f32 to vector<8x256xf32>
    %6 = arith.addf %3, %5 : vector<8x256xf32>
    %7 = math.log %6 : vector<8x256xf32>
    %cst_4 = arith.constant 1.000000e+00 : f32
    %8 = vector.broadcast %cst_4 : f32 to vector<8x256xf32>
    %9 = arith.subf %8, %3 : vector<8x256xf32>
    %cst_5 = arith.constant 9.99999971E-10 : f32
    %10 = vector.broadcast %cst_5 : f32 to vector<8x256xf32>
    %11 = arith.addf %9, %10 : vector<8x256xf32>
    %12 = math.log %11 : vector<8x256xf32>
    %13 = tpu.concatenate %4, %4, %4, %4, %4, %4, %4, %4 in 1 : vector<8x32xf32>, vector<8x32xf32>, vector<8x32xf32>, vector<8x32xf32>, vector<8x32xf32>, vector<8x32xf32>, vector<8x32xf32>, vector<8x32xf32> -> vector<8x256xf32>
    %c0_6 = arith.constant 0 : index
    %c0_7 = arith.constant 0 : index
    %14 = vector.load %arg4[%c0_6, %c0_7] : memref<8x1xf32, #tpu.memory_space<vmem>>, vector<8x1xf32>
    %15 = arith.subf %7, %12 : vector<8x256xf32>
    %16 = arith.mulf %13, %15 : vector<8x256xf32>
    %17 = arith.addf %12, %16 : vector<8x256xf32>
    %cst_8 = arith.constant dense<0.000000e+00> : vector<8xf32>
    %18 = vector.multi_reduction <add>, %17, %cst_8 [1] : vector<8x256xf32> to vector<8xf32>
    %19 = vector.shape_cast %18 : vector<8xf32> to vector<8x1xf32>
    %20 = arith.addf %14, %19 : vector<8x1xf32>
    %c0_9 = arith.constant 0 : index
    %c0_10 = arith.constant 0 : index
    %21 = vector.load %arg4[%c0_9, %c0_10] : memref<8x1xf32, #tpu.memory_space<vmem>>, vector<8x1xf32>
    tpu.vector_store %arg4[%c0_9, %c0_10], %20 {strides = array<i32>} : memref<8x1xf32, #tpu.memory_space<vmem>>, vector<8x1xf32>,
    %c0_i32_11 = arith.constant 0 : i32
    %22 = arith.cmpi eq, %arg1, %c0_i32_11 : i32
    %23 = arith.extui %22 : i1 to i32
    %c0_i32_12 = arith.constant 0 : i32
    %24 = arith.cmpi ne, %23, %c0_i32_12 : i32
    scf.if %24 {
      %c0_13 = arith.constant 0 : index
      %c0_14 = arith.constant 0 : index
      %25 = vector.load %arg4[%c0_13, %c0_14] : memref<8x1xf32, #tpu.memory_space<vmem>>, vector<8x1xf32>
      %cst_15 = arith.constant -1.250000e-01 : f32
      %26 = vector.broadcast %cst_15 : f32 to vector<8x1xf32>
      %27 = arith.mulf %25, %26 : vector<8x1xf32>
      %c0_16 = arith.constant 0 : index
      %c0_17 = arith.constant 0 : index
      %28 = vector.load %arg4[%c0_16, %c0_17] : memref<8x1xf32, #tpu.memory_space<vmem>>, vector<8x1xf32>
      tpu.vector_store %arg4[%c0_16, %c0_17], %27 {strides = array<i32>} : memref<8x1xf32, #tpu.memory_space<vmem>>, vector<8x1xf32>,
    } else {
    }
    return
  }
  func.func @transform_0(%arg0: i32, %arg1: i32) -> (i32, i32) {
    %c0_i32 = arith.constant 0 : i32
    return %arg0, %arg1 : i32, i32
  }
  func.func @transform_1(%arg0: i32, %arg1: i32) -> (i32, i32) {
    %c0_i32 = arith.constant 0 : i32
    %c0_i32_0 = arith.constant 0 : i32
    return %arg0, %c0_i32 : i32, i32
  }
  func.func @transform_2(%arg0: i32, %arg1: i32) -> (i32, i32) {
    %c0_i32 = arith.constant 0 : i32
    %c0_i32_0 = arith.constant 0 : i32
    return %arg0, %c0_i32 : i32, i32
  }
}

</mosaic_0001>

<bundles_post_ra>
// kernel: tpu_custom_call.1
= control target key start
LH: loop header
LB: loop body
LE: loop exit
PB: predicated region body
PF: predicated region fallthrough
CT: control target
= control target key end

     0   :  { %7 = vsyncpa [#allocation3], 0  ;;  %s214_s0 = inlined_call_operand.hbm [shape: f32[8,256], index: 0, kind: input, shape index: {}]   ;;  %s215_s1 = inlined_call_operand.hbm [shape: f32[8,32], index: 1, kind: input, shape index: {}]   ;;  %s216_s2 = inlined_call_operand.vmem [shape: f32[8,1], index: 2, kind: output, shape index: {}]  }
   0x1   :  { %s14_s11 = sshll.u32 %s214_s0, 4  ;;  %s15_s11 = int_to_ptr.hbm [resolvable:$true] %s14_s11 }
   0x2   :  { %8 = vsyncpa [#allocation5], 0  ;;  %s169_s12 = smov [#allocation2]   ;;  %s25_s16 = sshll.u32 %s215_s1, 4  ;;  %s26_s16 = int_to_ptr.hbm [resolvable:$true] %s25_s16 }
   0x3   :  { %s16_s13 = sshll.u32 %s169_s12, 4  ;;  %s170_s17 = smov [#allocation4]   ;;  %s17_s13 = int_to_ptr.vmem [resolvable:$true] %s16_s13 }
   0x4   :  { %19 = dma.hbm_to_vmem [thread:$0]  %s15_s11, 256, %s17_s13, [#allocation3]  }
   0x5   :  { %s27_s18 = sshll.u32 %s170_s17, 4  ;;  %s28_s18 = int_to_ptr.vmem [resolvable:$true] %s27_s18 }
   0x6   :  { %30 = dma.hbm_to_vmem [thread:$0]  %s26_s16, 128, %s28_s18, [#allocation5]  }
   0x7   :  { %165 = dma.done.wait [#allocation3], 256  }
   0x8   :  { %166 = vsyncadd [#allocation3], 4294967040 }
   0x9   :  { %167 = dma.done.wait [#allocation5], 128  }
   0xa   :  { %168 = vsyncadd [#allocation5], 4294967168  ;;  %v47_v0 = vld [vmem:[#allocation4] sm:$0xff]  ;;  %s171_s0 = smov 32   ;;  %s172_s19 = smov 96   ;;  %v45_v1 = vld [vmem:[#allocation2] sm:$0xff] }
   0xb   :  { %63 = vrot.lane.b32.xlu0 %v47_v0, %s171_s0  ;;  %69 = vrot.lane.b32.xlu1 %v47_v0, %s172_s19  ;;  %s173_s20 = smov 64   ;;  %v46_v2 = vld [vmem:[#allocation2 + $0x8] sm:$0xff]  ;;  %v54_v3 = vsub.f32 1.0, %v45_v1  ;;  %vm43_vm0 = vcmask 7168   ;;  %v174_v5 = vmov 0.0   ;;  %vm72_vm1 = vcmask 261120  }
   0xc   :  { %v55_v4 = vsub.f32 1.0, %v46_v2  ;;  %44 = vst.msk [vmem:[%s216_s2] sm:$0xff] %vm43_vm0, %v174_v5  ;;  %v48_v6 = vadd.f32 1e-09, %v45_v1  ;;  %v49_v7 = vadd.f32 1e-09, %v46_v2 }
   0xd   :  { %v56_v8 = vadd.f32 1e-09, %v54_v3  ;;  %vm74_vm2 = vcmask 523264   ;;  %vm76_vm3 = vcmask 785408  }
   0xe   :  { %v57_v9 = vadd.f32 1e-09, %v55_v4  ;;  %109 = vlog2.f32 %v48_v6 }
   0xf   :  { %111 = vlog2.f32 %v49_v7 }
  0x10   :  { %113 = vlog2.f32 %v56_v8 }
  0x11   :  { %115 = vlog2.f32 %v57_v9 }
  0x13   :  { %66 = vrot.lane.b32.xlu0 %v47_v0, %s173_s20  ;;  %v78_v31 = vld [vmem:[%s216_s2] sm:$0xff] }
  0x14   :  { %v110_v10 = vpop.eup %109 }
  0x15   :  { %v112_v11 = vpop.eup %111  ;;  %v51_v15 = vmul.f32 0.6931472, %v110_v10 }
  0x16   :  { %v114_v12 = vpop.eup %113  ;;  %v53_v16 = vmul.f32 0.6931472, %v112_v11 }
  0x17   :  { %v116_v13 = vpop.eup %115  ;;  %v59_v17 = vmul.f32 0.6931472, %v114_v12 }
  0x18   :  { %v61_v18 = vmul.f32 0.6931472, %v116_v13 }
  0x19   :  { %v79_v20 = vsub.f32 %v51_v15, %v59_v17 }
  0x1a   :  { %v80_v21 = vsub.f32 %v53_v16, %v61_v18 }
  0x7d   :  { %v64_v14 = vpop.permute.xlu0 %63  ;;  %v70_v19 = vpop.permute.xlu1 %69 }
  0x7e   :  { %v73_v22 = vsel %vm72_vm1, %v47_v0, %v64_v14 }
  0x85   :  { %v67_v23 = vpop.permute.xlu0 %66 }
  0x86   :  { %v75_v24 = vsel %vm74_vm2, %v73_v22, %v67_v23 }
  0x87   :  { %v77_v25 = vsel %vm76_vm3, %v75_v24, %v70_v19 }
  0x88   :  { %v81_v26 = vmul.f32 %v79_v20, %v77_v25  ;;  %v82_v27 = vmul.f32 %v80_v21, %v77_v25 }
  0x8a   :  { %v83_v28 = vadd.f32 %v81_v26, %v59_v17  ;;  %v84_v29 = vadd.f32 %v82_v27, %v61_v18 }
  0x8c   :  { %v85_v30 = vadd.f32 %v84_v29, %v83_v28 }
  0x8e   :  { %86 = vadd.xlane.f32.xlu1 %v85_v30 }
 0x101   :  { %v87_v32 = vpop.xlane.xlu1 %86 }
 0x102   :  { %v88_v33 = vadd.f32 %v87_v32, %v78_v31 }
 0x104   :  { %90 = vst.msk [vmem:[%s216_s2] sm:$0xff] %vm43_vm0, %v88_v33 }
 0x10b   :  { %v94_v34 = vld [vmem:[%s216_s2] sm:$0xff] }
 0x10c   :  { %v95_v35 = vmul.f32 -0.125, %v94_v34 }
 0x10e   :  { %96 = vst.msk [vmem:[%s216_s2] sm:$0xff] %vm43_vm0, %v95_v35 }
 0x10f   :  { %101 = vsyncpa [#allocation3], 1 }
 0x110   :  { %102 = vsyncpa [#allocation5], 1 }

</bundles_post_ra>
